<compile_context>
chip_gen: v5e
topology: v5e:2x2
jax: 0.10.0
libtpu: 0.0.40
codegen_flags: <defaults>
</compile_context>

<pallas_src>
import functools
import math

import jax
import jax.numpy as jnp
from jax.experimental import pallas as pl
from jax.experimental.pallas import tpu as pltpu

HID = 100        # hidden width of self.linears in the PyTorch module
HID_PAD = 128    # lane-aligned hidden width used inside the kernel


def _round8(n):
    return ((n + 7) // 8) * 8


# ---------------------------------------------------------------------------
# Pallas kernel
# ---------------------------------------------------------------------------
def _hyperlora_kernel(task_nums, block_nums, in_dims, out_dims, rank,
                      tid_ref,    # SMEM (1,) int32                 task id
                      slab_ref,   # VMEM (rows, 128) f32  [task_h | block_h | W2 | b2]
                      head_ref,   # VMEM (129, rank*(in+out)) f32   [Wa|Wb ; ba|bb], rank-major
                      rep_ref,    # VMEM (in+out, out*in) f32       [T_a ; T_b] 0/1 matrices
                      out_ref):   # VMEM (block_nums, out*in) f32   lane-dense flat output
    r_blk = _round8(task_nums)
    r_w2 = r_blk + _round8(block_nums)
    r_b2 = r_w2 + HID_PAD

    # Clamp the task id so an out-of-range id can never read adjacent VMEM.
    tid = jnp.minimum(jnp.maximum(tid_ref[0], 0), task_nums - 1)

    # First Linear was hoisted to pack time: slab holds pre-activation rows.
    h_task = slab_ref[pl.ds(tid, 1), :]                         # (1, 128)
    h_blk = slab_ref[r_blk:r_blk + block_nums, :]               # (B, 128)
    h = jnp.maximum(h_blk + h_task, 0.0)                        # ReLU, layer 1

    w2 = slab_ref[r_w2:r_w2 + HID_PAD, :]                       # (128, 128)
    b2 = slab_ref[r_b2:r_b2 + 1, :]                             # (1, 128)
    h = jnp.dot(h, w2, preferred_element_type=jnp.float32) + b2
    h = jnp.maximum(h, 0.0)                                     # ReLU, layer 2 -> (B, 128)

    # Single fused 256-wide head matmul (linear_A | linear_B, rank-major cols).
    n_a = rank * in_dims
    w_head = head_ref[0:HID_PAD, :]                             # (128, 256)
    b_head = head_ref[HID_PAD:HID_PAD + 1, :]                   # (1, 256)
    ab = jnp.dot(h, w_head, preferred_element_type=jnp.float32) + b_head   # (B, 256)

    # matmul(lora_B, lora_A) computed directly in the lane-dense flat layout
    # flat[b, o*in + i] = sum_r B[b,o,r] * A[b,r,i].  Per rank, a_r is tiled
    # across out_dims and b_r replicated across in_dims via exact 0/1 matmuls
    # (MXU is otherwise idle), then combined with a VPU FMA on (B,1024) slabs.
    t_a = rep_ref[0:in_dims, :]                                 # (in,  out*in)
    t_b = rep_ref[in_dims:in_dims + out_dims, :]                # (out, out*in)

    def rank_term(r):
        a_r = ab[:, r * in_dims:(r + 1) * in_dims]                      # (B, in)
        b_r = ab[:, n_a + r * out_dims:n_a + (r + 1) * out_dims]        # (B, out)
        a_t = jnp.dot(a_r, t_a, preferred_element_type=jnp.float32)     # (B, out*in)
        b_t = jnp.dot(b_r, t_b, preferred_element_type=jnp.float32)     # (B, out*in)
        return a_t * b_t

    acc = rank_term(0)                       # init with r=0 term (no zero-fill pass)
    for r in range(1, rank):                 # rank is small & static -> unrolled
        acc = acc + rank_term(r)
    out_ref[...] = acc


def hyperlora_pallas(task_id, packed, *, task_nums, block_nums, in_dims, out_dims, rank):
    """Forward pass: one grid-less pallas_call, zero per-call array re-layout."""
    kernel = functools.partial(_hyperlora_kernel,
                               task_nums, block_nums, in_dims, out_dims, rank)
    vmem = lambda: pl.BlockSpec(memory_space=pltpu.MemorySpace.VMEM)
    smem = pl.BlockSpec(memory_space=pltpu.MemorySpace.SMEM)
    flat = pl.pallas_call(
        kernel,
        out_shape=jax.ShapeDtypeStruct((block_nums, out_dims * in_dims), jnp.float32),
        in_specs=[smem, vmem(), vmem(), vmem()],
        out_specs=vmem(),
    )(task_id, packed["slab"], packed["head"], packed["rep"])
    # Free layout plumbing: contiguous reshape back to (B, out, in).
    return flat.reshape(block_nums, out_dims, in_dims)


# ---------------------------------------------------------------------------
# Parameter construction (PyTorch-like init) + one-time packing
# ---------------------------------------------------------------------------
def make_params(key, *, task_nums, block_nums, task_emb_dims, block_emb_dims,
                in_dims, out_dims, rank):
    d_in = task_emb_dims + block_emb_dims
    ks = jax.random.split(key, 12)

    def linear(kw, kb, fan_in, fan_out):
        bound = 1.0 / math.sqrt(fan_in)
        w = jax.random.uniform(kw, (fan_in, fan_out), jnp.float32, -bound, bound)
        b = jax.random.uniform(kb, (fan_out,), jnp.float32, -bound, bound)
        return w, b

    params = {}
    params["task_embs"] = 0.1 * jax.random.normal(ks[0], (task_nums, task_emb_dims))
    params["block_emb"] = 0.1 * jax.random.normal(ks[1], (block_nums, block_emb_dims))
    params["w1"], params["b1"] = linear(ks[2], ks[3], d_in, HID)
    params["w2"], params["b2"] = linear(ks[4], ks[5], HID, HID)
    params["wa"], params["ba"] = linear(ks[6], ks[7], HID, in_dims * rank)    # linear_A
    params["wb"], params["bb"] = linear(ks[8], ks[9], HID, out_dims * rank)   # linear_B
    return params


def pack_params(params, *, task_emb_dims, in_dims, out_dims, rank):
    """One-time re-layout + constant folding (hoisted out of the forward path)."""
    f32 = jnp.float32
    task_embs = params["task_embs"].astype(f32)
    block_emb = params["block_emb"].astype(f32)
    w1, b1 = params["w1"].astype(f32), params["b1"].astype(f32)
    w2, b2 = params["w2"].astype(f32), params["b2"].astype(f32)
    wa, ba = params["wa"].astype(f32), params["ba"].astype(f32)
    wb, bb = params["wb"].astype(f32), params["bb"].astype(f32)

    task_nums = task_embs.shape[0]
    block_nums = block_emb.shape[0]
    hid = w1.shape[1]                       # 100
    pad_rows_hid = HID_PAD - hid

    # ---- hoisted first Linear (constant given static params) ----
    w1t, w1b = w1[:task_emb_dims], w1[task_emb_dims:]
    task_h = task_embs @ w1t                          # (task_nums, hid)
    block_h = block_emb @ w1b + b1[None, :]           # (block_nums, hid)

    def pad_block(x, rows):
        return jnp.pad(x, ((0, rows - x.shape[0]), (0, HID_PAD - x.shape[1])))

    # ---- slab of 128-wide constants, each section 8-row aligned ----
    slab = jnp.concatenate([
        pad_block(task_h, _round8(task_nums)),
        pad_block(block_h, _round8(block_nums)),
        pad_block(w2, HID_PAD),
        pad_block(b2[None, :], 8),
    ], axis=0)                                        # (rows, 128)

    # ---- fused rank-major LoRA heads: [Wa | Wb] and [ba | bb] ----
    # linear_A columns are already rank-major (f = r*in + i); permute linear_B
    # columns (o, r) -> rank-major (r, o) once.
    wb_rm = wb.reshape(hid, out_dims, rank).transpose(0, 2, 1).reshape(hid, rank * out_dims)
    bb_rm = bb.reshape(out_dims, rank).T.reshape(rank * out_dims)
    w_head = jnp.pad(jnp.concatenate([wa, wb_rm], axis=1),
                     ((0, pad_rows_hid), (0, 0)))                 # (128, rank*(in+out))
    b_head = jnp.concatenate([ba, bb_rm])[None, :]                # (1, rank*(in+out))
    head = jnp.concatenate([w_head, b_head], axis=0)              # (129, 256)

    # ---- 0/1 lane-replication matrices for the flat (out*in) output layout ----
    t_a = jnp.tile(jnp.eye(in_dims, dtype=f32), (1, out_dims))        # (in,  out*in)
    t_b = jnp.repeat(jnp.eye(out_dims, dtype=f32), in_dims, axis=1)   # (out, out*in)
    rep = jnp.concatenate([t_a, t_b], axis=0)                         # (in+out, out*in)

    return {"slab": slab, "head": head, "rep": rep}


# ---------------------------------------------------------------------------
# Pure-JAX reference mirroring the PyTorch forward
# ---------------------------------------------------------------------------
def hyperlora_reference(task_id, params, *, block_nums, in_dims, out_dims, rank):
    task_emb = params["task_embs"][task_id]
    task_emb = jnp.broadcast_to(task_emb[None, :], (block_nums, task_emb.shape[-1]))
    x = jnp.concatenate([task_emb, params["block_emb"]], axis=-1)
    x = jax.nn.relu(x @ params["w1"] + params["b1"])
    x = jax.nn.relu(x @ params["w2"] + params["b2"])
    lora_A = (x @ params["wa"] + params["ba"]).reshape(-1, rank, in_dims)
    lora_B = (x @ params["wb"] + params["bb"]).reshape(-1, out_dims, rank)
    return jnp.einsum("bor,bri->boi", lora_B, lora_A)


if __name__ == "__main__":
    TASK_NUMS = 3
    BLOCK_NUMS = 8
    TASK_EMB_DIMS = 16
    BLOCK_EMB_DIMS = 16
    IN_DIMS = 32
    OUT_DIMS = 32
    RANK = 4

    key = jax.random.PRNGKey(0)
    params = make_params(key,
                         task_nums=TASK_NUMS, block_nums=BLOCK_NUMS,
                         task_emb_dims=TASK_EMB_DIMS, block_emb_dims=BLOCK_EMB_DIMS,
                         in_dims=IN_DIMS, out_dims=OUT_DIMS, rank=RANK)
    # One-time packing / constant folding (hoisted out of the forward path).
    packed = pack_params(params, task_emb_dims=TASK_EMB_DIMS,
                         in_dims=IN_DIMS, out_dims=OUT_DIMS, rank=RANK)
    packed = jax.tree_util.tree_map(jax.block_until_ready, packed)

    task_id = jnp.array([1], dtype=jnp.int32)   # scalar task id, as in PyTorch

    out = hyperlora_pallas(task_id, packed,
                           task_nums=TASK_NUMS, block_nums=BLOCK_NUMS,
                           in_dims=IN_DIMS, out_dims=OUT_DIMS, rank=RANK)
    out = jax.block_until_ready(out)

    ref = hyperlora_reference(1, params,
                              block_nums=BLOCK_NUMS, in_dims=IN_DIMS,
                              out_dims=OUT_DIMS, rank=RANK)
    assert out.shape == (BLOCK_NUMS, OUT_DIMS, IN_DIMS)
    assert jnp.allclose(out, ref, atol=1e-4, rtol=1e-4)

    print("KERNEL_OK")
</pallas_src>

<mosaic_0001>
module attributes {stable_mosaic.version = 11 : i64} {
  func.func @_hyperlora_kernel(%arg0: memref<1xi32, #tpu.memory_space<smem>>, %arg1: memref<152x128xf32, #tpu.memory_space<vmem>>, %arg2: memref<129x256xf32, #tpu.memory_space<vmem>>, %arg3: memref<64x1024xf32, #tpu.memory_space<vmem>>, %arg4: memref<8x1024xf32, #tpu.memory_space<vmem>>) attributes {dimension_semantics = [], scalar_prefetch = 0 : i64, scratch_operands = 0 : i64, tpu.core_type = #tpu.core_type<tc>} {
    %c0 = arith.constant 0 : index
    %0 = memref.load %arg0[%c0] : memref<1xi32, #tpu.memory_space<smem>>
    %c0_i32 = arith.constant 0 : i32
    %1 = arith.maxsi %0, %c0_i32 : i32
    %c2_i32 = arith.constant 2 : i32
    %2 = arith.minsi %1, %c2_i32 : i32
    %3 = arith.index_cast %2 : i32 to index
    %c0_0 = arith.constant 0 : index
    %4 = vector.load %arg1[%3, %c0_0] : memref<152x128xf32, #tpu.memory_space<vmem>>, vector<1x128xf32>
    %c8 = arith.constant 8 : index
    %c0_1 = arith.constant 0 : index
    %5 = vector.load %arg1[%c8, %c0_1] : memref<152x128xf32, #tpu.memory_space<vmem>>, vector<8x128xf32>
    %6 = vector.broadcast %4 : vector<1x128xf32> to vector<8x128xf32>
    %7 = arith.addf %5, %6 : vector<8x128xf32>
    %cst = arith.constant 0.000000e+00 : f32
    %8 = vector.broadcast %cst : f32 to vector<8x128xf32>
    %9 = arith.maximumf %7, %8 : vector<8x128xf32>
    %c16 = arith.constant 16 : index
    %c0_2 = arith.constant 0 : index
    %10 = vector.load %arg1[%c16, %c0_2] : memref<152x128xf32, #tpu.memory_space<vmem>>, vector<128x128xf32>
    %c144 = arith.constant 144 : index
    %c0_3 = arith.constant 0 : index
    %11 = vector.load %arg1[%c144, %c0_3] : memref<152x128xf32, #tpu.memory_space<vmem>>, vector<1x128xf32>
    %cst_4 = arith.constant dense<0.000000e+00> : vector<8x128xf32>
    %12 = tpu.matmul %9, %10, %cst_4 {dimension_numbers = #tpu.dot_dimension_numbers<[1], [0], [0], [1], [0, 0, 1, 1], [], []>} : vector<8x128xf32>, vector<128x128xf32>, vector<8x128xf32> -> vector<8x128xf32>
    %13 = vector.broadcast %11 : vector<1x128xf32> to vector<8x128xf32>
    %14 = arith.addf %12, %13 : vector<8x128xf32>
    %cst_5 = arith.constant 0.000000e+00 : f32
    %15 = vector.broadcast %cst_5 : f32 to vector<8x128xf32>
    %16 = arith.maximumf %14, %15 : vector<8x128xf32>
    %c0_6 = arith.constant 0 : index
    %c0_7 = arith.constant 0 : index
    %17 = vector.load %arg2[%c0_6, %c0_7] : memref<129x256xf32, #tpu.memory_space<vmem>>, vector<128x256xf32>
    %c128 = arith.constant 128 : index
    %c0_8 = arith.constant 0 : index
    %18 = vector.load %arg2[%c128, %c0_8] : memref<129x256xf32, #tpu.memory_space<vmem>>, vector<1x256xf32>
    %cst_9 = arith.constant dense<0.000000e+00> : vector<8x256xf32>
    %19 = tpu.matmul %16, %17, %cst_9 {dimension_numbers = #tpu.dot_dimension_numbers<[1], [0], [0], [1], [0, 0, 1, 1], [], []>} : vector<8x128xf32>, vector<128x256xf32>, vector<8x256xf32> -> vector<8x256xf32>
    %20 = vector.broadcast %18 : vector<1x256xf32> to vector<8x256xf32>
    %21 = arith.addf %19, %20 : vector<8x256xf32>
    %c0_10 = arith.constant 0 : index
    %c0_11 = arith.constant 0 : index
    %22 = vector.load %arg3[%c0_10, %c0_11] : memref<64x1024xf32, #tpu.memory_space<vmem>>, vector<32x1024xf32>
    %c32 = arith.constant 32 : index
    %c0_12 = arith.constant 0 : index
    %23 = vector.load %arg3[%c32, %c0_12] : memref<64x1024xf32, #tpu.memory_space<vmem>>, vector<32x1024xf32>
    %24 = vector.extract_strided_slice %21 {offsets = [0, 0], sizes = [8, 32], strides = [1, 1]} : vector<8x256xf32> to vector<8x32xf32>
    %25 = vector.extract_strided_slice %21 {offsets = [0, 128], sizes = [8, 32], strides = [1, 1]} : vector<8x256xf32> to vector<8x32xf32>
    %cst_13 = arith.constant dense<0.000000e+00> : vector<8x1024xf32>
    %26 = tpu.matmul %24, %22, %cst_13 {dimension_numbers = #tpu.dot_dimension_numbers<[1], [0], [0], [1], [0, 0, 1, 1], [], []>} : vector<8x32xf32>, vector<32x1024xf32>, vector<8x1024xf32> -> vector<8x1024xf32>
    %cst_14 = arith.constant dense<0.000000e+00> : vector<8x1024xf32>
    %27 = tpu.matmul %25, %23, %cst_14 {dimension_numbers = #tpu.dot_dimension_numbers<[1], [0], [0], [1], [0, 0, 1, 1], [], []>} : vector<8x32xf32>, vector<32x1024xf32>, vector<8x1024xf32> -> vector<8x1024xf32>
    %28 = arith.mulf %26, %27 : vector<8x1024xf32>
    %29 = vector.extract_strided_slice %21 {offsets = [0, 32], sizes = [8, 32], strides = [1, 1]} : vector<8x256xf32> to vector<8x32xf32>
    %30 = vector.extract_strided_slice %21 {offsets = [0, 160], sizes = [8, 32], strides = [1, 1]} : vector<8x256xf32> to vector<8x32xf32>
    %cst_15 = arith.constant dense<0.000000e+00> : vector<8x1024xf32>
    %31 = tpu.matmul %29, %22, %cst_15 {dimension_numbers = #tpu.dot_dimension_numbers<[1], [0], [0], [1], [0, 0, 1, 1], [], []>} : vector<8x32xf32>, vector<32x1024xf32>, vector<8x1024xf32> -> vector<8x1024xf32>
    %cst_16 = arith.constant dense<0.000000e+00> : vector<8x1024xf32>
    %32 = tpu.matmul %30, %23, %cst_16 {dimension_numbers = #tpu.dot_dimension_numbers<[1], [0], [0], [1], [0, 0, 1, 1], [], []>} : vector<8x32xf32>, vector<32x1024xf32>, vector<8x1024xf32> -> vector<8x1024xf32>
    %33 = arith.mulf %31, %32 : vector<8x1024xf32>
    %34 = arith.addf %28, %33 : vector<8x1024xf32>
    %35 = vector.extract_strided_slice %21 {offsets = [0, 64], sizes = [8, 32], strides = [1, 1]} : vector<8x256xf32> to vector<8x32xf32>
    %36 = vector.extract_strided_slice %21 {offsets = [0, 192], sizes = [8, 32], strides = [1, 1]} : vector<8x256xf32> to vector<8x32xf32>
    %cst_17 = arith.constant dense<0.000000e+00> : vector<8x1024xf32>
    %37 = tpu.matmul %35, %22, %cst_17 {dimension_numbers = #tpu.dot_dimension_numbers<[1], [0], [0], [1], [0, 0, 1, 1], [], []>} : vector<8x32xf32>, vector<32x1024xf32>, vector<8x1024xf32> -> vector<8x1024xf32>
    %cst_18 = arith.constant dense<0.000000e+00> : vector<8x1024xf32>
    %38 = tpu.matmul %36, %23, %cst_18 {dimension_numbers = #tpu.dot_dimension_numbers<[1], [0], [0], [1], [0, 0, 1, 1], [], []>} : vector<8x32xf32>, vector<32x1024xf32>, vector<8x1024xf32> -> vector<8x1024xf32>
    %39 = arith.mulf %37, %38 : vector<8x1024xf32>
    %40 = arith.addf %34, %39 : vector<8x1024xf32>
    %41 = vector.extract_strided_slice %21 {offsets = [0, 96], sizes = [8, 32], strides = [1, 1]} : vector<8x256xf32> to vector<8x32xf32>
    %42 = vector.extract_strided_slice %21 {offsets = [0, 224], sizes = [8, 32], strides = [1, 1]} : vector<8x256xf32> to vector<8x32xf32>
    %cst_19 = arith.constant dense<0.000000e+00> : vector<8x1024xf32>
    %43 = tpu.matmul %41, %22, %cst_19 {dimension_numbers = #tpu.dot_dimension_numbers<[1], [0], [0], [1], [0, 0, 1, 1], [], []>} : vector<8x32xf32>, vector<32x1024xf32>, vector<8x1024xf32> -> vector<8x1024xf32>
    %cst_20 = arith.constant dense<0.000000e+00> : vector<8x1024xf32>
    %44 = tpu.matmul %42, %23, %cst_20 {dimension_numbers = #tpu.dot_dimension_numbers<[1], [0], [0], [1], [0, 0, 1, 1], [], []>} : vector<8x32xf32>, vector<32x1024xf32>, vector<8x1024xf32> -> vector<8x1024xf32>
    %45 = arith.mulf %43, %44 : vector<8x1024xf32>
    %46 = arith.addf %40, %45 : vector<8x1024xf32>
    %c0_21 = arith.constant 0 : index
    %c0_22 = arith.constant 0 : index
    %47 = vector.load %arg4[%c0_21, %c0_22] : memref<8x1024xf32, #tpu.memory_space<vmem>>, vector<8x1024xf32>
    tpu.vector_store %arg4[%c0_21, %c0_22], %46 {strides = array<i32>} : memref<8x1024xf32, #tpu.memory_space<vmem>>, vector<8x1024xf32>,
    return
  }
}

</mosaic_0001>

<bundles_post_ra>
// kernel: tpu_custom_call.1
= control target key start
LH: loop header
LB: loop body
LE: loop exit
PB: predicated region body
PF: predicated region fallthrough
CT: control target
= control target key end

     0   :  { %10 = vsyncpa [#allocation4], 0  ;;  %s2410_s0 = inlined_call_operand.<no memory space> [shape: s32[1], index: 0, kind: input, shape index: {}]   ;;  %s2411_s1 = inlined_call_operand.hbm [shape: f32[152,128], index: 1, kind: input, shape index: {}]   ;;  %s2412_s2 = inlined_call_operand.hbm [shape: f32[129,256], index: 2, kind: input, shape index: {}]   ;;  %s2413_s3 = inlined_call_operand.hbm [shape: f32[64,1024], index: 3, kind: input, shape index: {}]   ;;  %s2414_s4 = inlined_call_operand.hbm [shape: f32[8,1024], index: 4, kind: output, shape index: {}]  }
   0x1   :  { %11 = vsyncpa [#allocation7], 0  ;;  %s32_s17 = sshll.u32 %s2412_s2, 4  ;;  %s33_s17 = int_to_ptr.hbm [resolvable:$true] %s32_s17 }
   0x2   :  { %12 = vsyncpa [#allocation5], 0  ;;  %s1840_s18 = smov [#allocation6]   ;;  %s19_s22 = sshll.u32 %s2411_s1, 4  ;;  %s20_s22 = int_to_ptr.hbm [resolvable:$true] %s19_s22 }
   0x3   :  { %s34_s19 = sshll.u32 %s1840_s18, 4  ;;  %s1841_s23 = smov 256   ;;  %s35_s19 = int_to_ptr.vmem [resolvable:$true] %s34_s19 }
   0x4   :  { %s1842_s24 = smov 16   ;;  %s1843_s25 = smov [#allocation3]  }
   0x5   :  { %40 = dma.hbm_to_vmem [thread:$0]  %s33_s17, 4352, %s35_s19, [#allocation7], %s1841_s23, %s1841_s23, %s1842_s24  }
   0x6   :  { %s21_s26 = sshll.u32 %s1843_s25, 4  ;;  %s1844_s27 = smov 128   ;;  %s22_s26 = int_to_ptr.vmem [resolvable:$true] %s21_s26 }
   0x7   :  { %s1845_s28 = smov 8   ;;  %s45_s30 = sshll.u32 %s2413_s3, 4  ;;  %s46_s30 = int_to_ptr.hbm [resolvable:$true] %s45_s30 }
   0x8   :  { %27 = dma.hbm_to_vmem [thread:$0]  %s20_s22, 2432, %s22_s26, [#allocation4], %s1844_s27, %s1844_s27, %s1845_s28  }
   0x9   :  { %s1846_s5 = smov [#allocation8]   ;;  %s1847_s7 = smov 1024  }
   0xa   :  { %s47_s6 = sshll.u32 %s1846_s5, 4  ;;  %s1848_s1 = smov 64   ;;  %s48_s6 = int_to_ptr.vmem [resolvable:$true] %s47_s6 }
   0xb   :  { %53 = dma.hbm_to_vmem [thread:$0]  %s46_s30, 8192, %s48_s6, [#allocation7], %s1847_s7, %s1847_s7, %s1848_s1  }
   0xc   :  { %1834 = dma.done.wait [#allocation4], 2432  }
   0xd   :  { %1835 = vsyncadd [#allocation4], 4294964864 }
   0xe   :  { %1836 = dma.done.wait [#allocation7], 12544  }
   0xf   :  { %1837 = vsyncadd [#allocation7], 4294954752  ;;  %p67_p0 = scmp.gt.s32.totalorder %s2410_s0, 0  ;;  %p1653_p1 = scmp.lt.s32.totalorder %s2410_s0, 2  ;;  %v92_v0 = vld [vmem:[#allocation3 + $0x88] sm:$0xff]  ;;  %v91_v1 = vld [vmem:[#allocation3 + $0x80] sm:$0xff] }
  0x10   :  { %95 = vmatpush.msra.mxu0 %v92_v0  ;;  %v90_v2 = vld [vmem:[#allocation3 + $0x78] sm:$0xff]  ;;  %v89_v3 = vld [vmem:[#allocation3 + $0x70] sm:$0xff]  ;;  %v88_v4 = vld [vmem:[#allocation3 + $0x68] sm:$0xff]  ;;  %vm259_vm0 = vcmask 261120   ;;  %s1850_s14 = smov 96   ;;  %s1851_s15 = smov [#allocation9]  }
  0x11   :  { %s2462_s0 = smov (!%p67_p0, %s2410_s0), 0  ;;  %v146_v5 = vld [vmem:[#allocation6 + $0xf0] sm:$0xff]  ;;  %v147_v6 = vld [vmem:[#allocation6 + $0xf8] sm:$0xff]  ;;  %v144_v7 = vld [vmem:[#allocation6 + $0xe0] sm:$0xff]  ;;  %s1639_s16 = sshll.u32 %s1851_s15, 4  ;;  %s1640_s16 = int_to_ptr.vmem [resolvable:$true] %s1639_s16 }
  0x12   :  { %s2464_s0 = smov (!%p1653_p1, %s2462_s0), 2  ;;  %96 = vmatpush.msra.mxu0 %v91_v1  ;;  %155 = vmatpush.msra.mxu1 %v146_v5  ;;  %v145_v8 = vld [vmem:[#allocation6 + $0xe8] sm:$0xff]  ;;  %v142_v10 = vld [vmem:[#allocation6 + $0xd0] sm:$0xff]  ;;  %v143_v11 = vld [vmem:[#allocation6 + $0xd8] sm:$0xff]  ;;  %s1641_s19 = sshll.u32 %s2414_s4, 4  ;;  %s1642_s19 = int_to_ptr.hbm [resolvable:$true] %s1641_s19 }
  0x13   :  { %s71_s13 = scalar_lea.vmem [#allocation3], %s2464_s0  ;;  %v87_v9 = vld [vmem:[#allocation3 + $0x60] sm:$0xff]  ;;  %175 = vmatpush.msra.mxu2 %v147_v6  ;;  %v86_v12 = vld [vmem:[#allocation3 + $0x58] sm:$0xff]  ;;  %v85_v15 = vld [vmem:[#allocation3 + $0x50] sm:$0xff]  ;;  %s1849_s0 = smov 32  }
  0x14   :  { %97 = vmatpush.msra.mxu0 %v90_v2  ;;  %156 = vmatpush.msra.mxu1 %v144_v7  ;;  %v140_v13 = vld [vmem:[#allocation6 + $0xc0] sm:$0xff]  ;;  %v141_v14 = vld [vmem:[#allocation6 + $0xc8] sm:$0xff]  ;;  %v138_v16 = vld [vmem:[#allocation6 + $0xb0] sm:$0xff] }
  0x15   :  { %176 = vmatpush.msra.mxu2 %v145_v8  ;;  %v139_v17 = vld [vmem:[#allocation6 + $0xb8] sm:$0xff]  ;;  %v84_v18 = vld [vmem:[#allocation3 + $0x48] sm:$0xff]  ;;  %v136_v19 = vld [vmem:[#allocation6 + $0xa0] sm:$0xff] }
  0x16   :  { %98 = vmatpush.msra.mxu0 %v89_v3  ;;  %157 = vmatpush.msra.mxu1 %v142_v10  ;;  %v137_v20 = vld [vmem:[#allocation6 + $0xa8] sm:$0xff]  ;;  %v134_v22 = vld [vmem:[#allocation6 + $0x90] sm:$0xff]  ;;  %v135_v23 = vld [vmem:[#allocation6 + $0x98] sm:$0xff] }
  0x17   :  { %177 = vmatpush.msra.mxu2 %v143_v11  ;;  %v83_v21 = vld [vmem:[#allocation3 + $0x40] sm:$0xff]  ;;  %v82_v24 = vld [vmem:[#allocation3 + $0x38] sm:$0xff]  ;;  %v81_v27 = vld [vmem:[#allocation3 + $0x30] sm:$0xff] }
  0x18   :  { %99 = vmatpush.msra.mxu0 %v88_v4  ;;  %158 = vmatpush.msra.mxu1 %v140_v13  ;;  %v132_v25 = vld [vmem:[#allocation6 + $0x80] sm:$0xff]  ;;  %v133_v26 = vld [vmem:[#allocation6 + $0x88] sm:$0xff]  ;;  %v130_v29 = vld [vmem:[#allocation6 + $0x70] sm:$0xff] }
  0x19   :  { %178 = vmatpush.msra.mxu2 %v141_v14  ;;  %v1736_v28 = vld [vmem:[%s71_s13] ss:$0 sm:$0xff]  ;;  %v73_v30 = vld [vmem:[#allocation3 + $0x8] sm:$0xff]  ;;  %v131_v31 = vld [vmem:[#allocation6 + $0x78] sm:$0xff] }
  0x1a   :  { %100 = vmatpush.msra.mxu0 %v87_v9  ;;  %159 = vmatpush.msra.mxu1 %v138_v16  ;;  %v80_v32 = vld [vmem:[#allocation3 + $0x28] sm:$0xff]  ;;  %v128_v33 = vld [vmem:[#allocation6 + $0x60] sm:$0xff]  ;;  %v129_v34 = vld [vmem:[#allocation6 + $0x68] sm:$0xff]  ;;  %v75_v36 = vadd.f32 %v1736_v28, %v73_v30 }
  0x1b   :  { %179 = vmatpush.msra.mxu2 %v139_v17  ;;  %v79_v35 = vld [vmem:[#allocation3 + $0x20] sm:$0xff]  ;;  %v126_v37 = vld [vmem:[#allocation6 + $0x50] sm:$0xff]  ;;  %v127_v38 = vld [vmem:[#allocation6 + $0x58] sm:$0xff] }
  0x1c   :  { %101 = vmatpush.msra.mxu0 %v86_v12  ;;  %160 = vmatpush.msra.mxu1 %v136_v19  ;;  %v78_v39 = vld [vmem:[#allocation3 + $0x18] sm:$0xff]  ;;  %v125_v41 = vld [vmem:[#allocation6 + $0x48] sm:$0xff]  ;;  %v77_v42 = vld [vmem:[#allocation3 + $0x10] sm:$0xff]  ;;  %v76_v43 = vmax.f32 %v75_v36, 0.0 }
  0x1d   :  { %180 = vmatpush.msra.mxu2 %v137_v20  ;;  %v124_v40 = vld [vmem:[#allocation6 + $0x40] sm:$0xff]  ;;  %v122_v44 = vld [vmem:[#allocation6 + $0x30] sm:$0xff]  ;;  %v123_v45 = vld [vmem:[#allocation6 + $0x38] sm:$0xff] }
  0x1e   :  { %102 = vmatpush.msra.mxu0 %v85_v15  ;;  %161 = vmatpush.msra.mxu1 %v134_v22  ;;  %v120_v46 = vld [vmem:[#allocation6 + $0x20] sm:$0xff]  ;;  %v121_v47 = vld [vmem:[#allocation6 + $0x28] sm:$0xff]  ;;  %v118_v48 = vld [vmem:[#allocation6 + $0x10] sm:$0xff] }
  0x1f   :  { %181 = vmatpush.msra.mxu2 %v135_v23  ;;  %v119_v49 = vld [vmem:[#allocation6 + $0x18] sm:$0xff]  ;;  %v116_v50 = vld [vmem:[#allocation6] sm:$0xff]  ;;  %v117_v51 = vld [vmem:[#allocation6 + $0x8] sm:$0xff] }
  0x20   :  { %103 = vmatpush.msra.mxu0 %v84_v18  ;;  %162 = vmatpush.msra.mxu1 %v132_v25  ;;  %v1901_v52 = vld [vmem:[#allocation8 + $0xc0] sm:$0xff]  ;;  %v1905_v54 = vld [vmem:[#allocation8 + $0xe8] sm:$0xff]  ;;  %v1909_v55 = vld [vmem:[#allocation8 + $0xf0] sm:$0xff] }
  0x21   :  { %182 = vmatpush.msra.mxu2 %v133_v26  ;;  %v1903_v53 = vld [vmem:[#allocation8 + $0xe0] sm:$0xff]  ;;  %275 = vmatpush.msra.mxu3 %v1901_v52  ;;  %v1917_v58 = vld [vmem:[#allocation8 + $0xa8] sm:$0xff]  ;;  %v1919_v59 = vld [vmem:[#allocation8 + $0xb0] sm:$0xff] }
  0x22   :  { %104 = vmatpush.msra.mxu0 %v83_v21  ;;  %163 = vmatpush.msra.mxu1 %v130_v29  ;;  %v1911_v56 = vld [vmem:[#allocation8 + $0x80] sm:$0xff]  ;;  %v1737_v60 = vld [vmem:[#allocation3 + $0x90] ss:$0 sm:$0xff]  ;;  %v1933_v3 = vld [vmem:[#allocation8 + $0x70] sm:$0xff] }
  0x23   :  { %183 = vmatpush.msra.mxu2 %v131_v31  ;;  %v1913_v57 = vld [vmem:[#allocation8 + $0xa0] sm:$0xff]  ;;  %276 = vmatpush.msra.mxu3 %v1911_v56  ;;  %v1929_v2 = vld [vmem:[#allocation8 + $0x68] sm:$0xff]  ;;  %v1945_v7 = vld [vmem:[#allocation8 + $0x30] sm:$0xff] }
  0x24   :  { %105 = vmatpush.msra.mxu0 %v82_v24  ;;  %164 = vmatpush.msra.mxu1 %v128_v33  ;;  %v1925_v0 = vld [vmem:[#allocation8 + $0x40] sm:$0xff]  ;;  %v1941_v6 = vld [vmem:[#allocation8 + $0x28] sm:$0xff]  ;;  %v1957_v11 = vld [vmem:[#allocation8 + $0x1d0] sm:$0xff] }
  0x25   :  { %184 = vmatpush.msra.mxu2 %v129_v34  ;;  %v1927_v1 = vld [vmem:[#allocation8 + $0x60] sm:$0xff]  ;;  %277 = vmatpush.msra.mxu3 %v1925_v0  ;;  %2430 = vst [vmem:[#allocation14_spill] sm:$0xff] %v1941_v6  ;;  %v1949_v8 = vld [vmem:[#allocation8 + $0xc8] sm:$0xff]  ;;  %v1967_v15 = vld [vmem:[#allocation8 + $0x190] sm:$0xff] }
  0x26   :  { %106 = vmatpush.msra.mxu0 %v81_v27  ;;  %165 = vmatpush.msra.mxu1 %v126_v37  ;;  %v1937_v4 = vld [vmem:[#allocation8] sm:$0xff]  ;;  %v1953_v10 = vld [vmem:[#allocation8 + $0x1c8] sm:$0xff]  ;;  %2431 = vst [vmem:[#allocation15_spill] sm:$0xff] %v1967_v15  ;;  %v1977_v19 = vld [vmem:[#allocation8 + $0x150] sm:$0xff] }
  0x27   :  { %185 = vmatpush.msra.mxu2 %v127_v38  ;;  %v1939_v5 = vld [vmem:[#allocation8 + $0x20] sm:$0xff]  ;;  %278 = vmatpush.msra.mxu3 %v1937_v4  ;;  %v1959_v12 = vld [vmem:[#allocation8 + $0x88] sm:$0xff]  ;;  %v1989_v23 = vld [vmem:[#allocation8 + $0x110] sm:$0xff] }
  0x28   :  { %107 = vmatpush.msra.mxu0 %v80_v32  ;;  %166 = vmatpush.msra.mxu1 %v124_v40  ;;  %2429 = vst [vmem:[#allocation13_spill] sm:$0xff] %v1939_v5  ;;  %v1951_v9 = vld [vmem:[#allocation8 + $0x1c0] sm:$0xff]  ;;  %v1965_v14 = vld [vmem:[#allocation8 + $0x188] sm:$0xff]  ;;  %v149_v24 = vld [vmem:[#allocation6 + $0x100] ss:$8 sm:$0x3] }
  0x29   :  { %186 = vmatpush.msra.mxu2 %v125_v41  ;;  %295 = vmatpush.msrb.mxu3 %v1949_v8  ;;  %v1961_v13 = vld [vmem:[#allocation8 + $0x180] sm:$0xff]  ;;  %v1969_v16 = vld [vmem:[#allocation8 + $0x48] sm:$0xff]  ;;  %v151_v25 = vperm.slane %v149_v24, 0  ;;  %v2002_v28 = vld [vmem:[#allocation8 + $0xd0] sm:$0xff]  ;;  %v152_v31 = vperm.slane %v149_v24, 1 }
  0x2a   :  { %108 = vmatpush.msra.mxu0 %v79_v35  ;;  %167 = vmatpush.msra.mxu1 %v122_v44  ;;  %v1973_v17 = vld [vmem:[#allocation8 + $0x140] sm:$0xff]  ;;  %v1975_v18 = vld [vmem:[#allocation8 + $0x148] sm:$0xff]  ;;  %v2015_v32 = vld [vmem:[#allocation8 + $0x1f0] sm:$0xff] }
  0x2b   :  { %187 = vmatpush.msra.mxu2 %v123_v45  ;;  %296 = vmatpush.msrb.mxu3 %v1959_v12  ;;  %2432 = vst [vmem:[#allocation16_spill] sm:$0xff] %v1975_v18  ;;  %v1981_v20 = vld [vmem:[#allocation8 + $0x8] sm:$0xff]  ;;  %v1983_v21 = vld [vmem:[#allocation8 + $0x100] sm:$0xff]  ;;  %v2017_v33 = vld [vmem:[#allocation8 + $0x90] sm:$0xff] }
  0x2c   :  { %109 = vmatpush.msra.mxu0 %v78_v39  ;;  %168 = vmatpush.msra.mxu1 %v120_v46  ;;  %2433 = vst [vmem:[#allocation17_spill] sm:$0xff] %v1983_v21  ;;  %v1987_v22 = vld [vmem:[#allocation8 + $0x108] sm:$0xff]  ;;  %v2007_v29 = vld [vmem:[#allocation8 + $0x1e0] sm:$0xff]  ;;  %v2028_v37 = vld [vmem:[#allocation8 + $0x1b0] sm:$0xff] }
  0x2d   :  { %188 = vmatpush.msra.mxu2 %v121_v47  ;;  %297 = vmatpush.msrb.mxu3 %v1969_v16  ;;  %2434 = vst [vmem:[#allocation18_spill] sm:$0xff] %v1987_v22  ;;  %v2009_v30 = vld [vmem:[#allocation8 + $0x1e8] sm:$0xff]  ;;  %v2022_v35 = vld [vmem:[#allocation8 + $0x1a0] sm:$0xff]  ;;  %v2030_v38 = vld [vmem:[#allocation8 + $0x50] sm:$0xff] }
  0x2e   :  { %110 = vmatpush.msra.mxu0 %v77_v42  ;;  %169 = vmatpush.msra.mxu1 %v118_v48  ;;  %2435 = vst [vmem:[#allocation19_spill] sm:$0xff] %v2022_v35  ;;  %v2024_v36 = vld [vmem:[#allocation8 + $0x1a8] sm:$0xff]  ;;  %v2043_v40 = vld [vmem:[#allocation8 + $0x160] sm:$0xff]  ;;  %v2050_v42 = vld [vmem:[#allocation8 + $0x170] sm:$0xff] }
  0x2f   :  { %111 = vmatmul.f32.vlgmr.msra.gmra.mxu0 %v76_v43  ;;  %189 = vmatpush.msra.mxu2 %v119_v49  ;;  %2436 = vst [vmem:[#allocation20_spill] sm:$0xff] %v2024_v36  ;;  %v2048_v41 = vld [vmem:[#allocation8 + $0x168] sm:$0xff]  ;;  %v2056_v43 = vld [vmem:[#allocation8 + $0x10] sm:$0xff]  ;;  %v2058_v44 = vld [vmem:[#allocation8 + $0x120] sm:$0xff] }
  0x30   :  { %170 = vmatpush.msra.mxu1 %v116_v50  ;;  %355 = vmatpush.msrb.mxu0 %v1903_v53  ;;  %v2063_v45 = vld [vmem:[#allocation8 + $0x128] sm:$0xff]  ;;  %v2065_v46 = vld [vmem:[#allocation8 + $0x130] sm:$0xff]  ;;  %v2069_v47 = vld [vmem:[#allocation8 + $0xd8] sm:$0xff] }
  0x31   :  { %190 = vmatpush.msra.mxu2 %v117_v51  ;;  %298 = vmatpush.msrb.mxu3 %v1981_v20  ;;  %v2077_v48 = vld [vmem:[#allocation8 + $0x98] sm:$0xff] }
  0x32   :  { %375 = vmatpush.msrb.mxu1 %v1905_v54  ;;  %356 = vmatpush.msrb.mxu0 %v1913_v57  ;;  %v2088_v49 = vld [vmem:[#allocation8 + $0x58] sm:$0xff] }
  0x33   :  { %395 = vmatpush.msrb.mxu2 %v1909_v55  ;;  %v2093_v50 = vld [vmem:[#allocation8 + $0x18] sm:$0xff] }
  0x34   :  { %376 = vmatpush.msrb.mxu1 %v1917_v58  ;;  %357 = vmatpush.msrb.mxu0 %v1927_v1  ;;  %v2098_v51 = vld [vmem:[#allocation8 + $0xf8] sm:$0xff] }
  0x35   :  { %396 = vmatpush.msrb.mxu2 %v1919_v59  ;;  %v2129_v24 = vld [vmem:[#allocation8 + $0x198] sm:$0xff] }
  0x36   :  { %377 = vmatpush.msrb.mxu1 %v1929_v2  ;;  %358 = vmatpush.msrb.mxu0 %v1939_v5 }
  0x37   :  { %397 = vmatpush.msrb.mxu2 %v1933_v3 }
  0x38   :  { %378 = vmatpush.msrb.mxu1 %v1941_v6  ;;  %438 = vmatpush.msra.mxu0 %v1951_v9 }
  0x39   :  { %398 = vmatpush.msrb.mxu2 %v1945_v7 }
  0x3a   :  { %439 = vmatpush.msra.mxu0 %v1961_v13 }
  0x3c   :  { %440 = vmatpush.msra.mxu0 %v1973_v17 }
  0x3e   :  { %441 = vmatpush.msra.mxu0 %v1983_v21 }
  0xac   :  { %v112_v61 = vpop.f32.mrf.mxu0 }
  0xad   :  { %v113_v62 = vadd.f32 %v1737_v60, %v112_v61  ;;  %v2104_v60 = vld [vmem:[#allocation8 + $0xb8] sm:$0xff] }
  0xae   :  { %v2111_v61 = vld [vmem:[#allocation8 + $0x78] sm:$0xff] }
  0xaf   :  { %v115_v63 = vmax.f32 %v113_v62, 0.0  ;;  %v2116_v62 = vld [vmem:[#allocation8 + $0x38] sm:$0xff] }
  0xb1   :  { %171 = vmatmul.f32.vlgmr.msra.gmra.mxu1 %v115_v63  ;;  %191 = vmatmul.f32.vlgmr.msra.gmra.mxu2 %v115_v63  ;;  %v2121_v63 = vld [vmem:[#allocation8 + $0x1d8] sm:$0xff] }
  0xb2   :  { %458 = vmatpush.msra.mxu1 %v1953_v10  ;;  %478 = vmatpush.msra.mxu2 %v1957_v11 }
  0xb4   :  { %459 = vmatpush.msra.mxu1 %v1965_v14  ;;  %479 = vmatpush.msra.mxu2 %v1967_v15 }
  0xb6   :  { %460 = vmatpush.msra.mxu1 %v1975_v18  ;;  %480 = vmatpush.msra.mxu2 %v1977_v19 }
  0xb8   :  { %461 = vmatpush.msra.mxu1 %v1987_v22  ;;  %481 = vmatpush.msra.mxu2 %v1989_v23 }
 0x12e   :  { %v172_v26 = vpop.f32.mrf.mxu1 }
 0x12f   :  { %v1997_v27 = vadd.f32 %v172_v26, %v151_v25  ;;  %v2136_v25 = vld [vmem:[#allocation8 + $0x158] sm:$0xff] }
 0x130   :  { %v2141_v26 = vld [vmem:[#allocation8 + $0x118] sm:$0xff] }
 0x131   :  { %1282 = vrot.lane.b32.xlu2 %v1997_v27, %s1849_s0  ;;  %938 = vrot.lane.b32.xlu1 %v1997_v27, %s1848_s1  ;;  %2437 = vst [vmem:[#allocation21_spill] sm:$0xff] %v2141_v26 }
 0x132   :  { %594 = vrot.lane.b32.xlu0 %v1997_v27, %s1850_s14  ;;  %1658 = vmatmul.msk.f32.vlgmr.msra.gmra.mxu3 %vm259_vm0, %v1997_v27 }
 0x133   :  { %1662 = vmatmul.msk.f32.vlgmr.msrb.gmra.mxu0 %vm259_vm0, %v1997_v27  ;;  %1663 = vmatmul.msk.f32.vlgmr.msrb.gmra.mxu1 %vm259_vm0, %v1997_v27 }
 0x134   :  { %1664 = vmatmul.msk.f32.vlgmr.msrb.gmra.mxu2 %vm259_vm0, %v1997_v27  ;;  %v192_v34 = vpop.f32.mrf.mxu2  ;;  %315 = vmatpush.msra.mxu3 %v2002_v28 }
 0x135   :  { %518 = vmatpush.msrb.mxu0 %v2007_v29  ;;  %538 = vmatpush.msrb.mxu1 %v2009_v30  ;;  %v2034_v39 = vadd.f32 %v192_v34, %v152_v31  ;;  %v2144_v31 = vld [vmem:[#allocation8 + $0x1f8] sm:$0xff] }
 0x136   :  { %558 = vmatpush.msrb.mxu2 %v2015_v32  ;;  %316 = vmatpush.msra.mxu3 %v2017_v33  ;;  %v2148_v34 = vld [vmem:[#allocation8 + $0x1b8] sm:$0xff] }
 0x137   :  { %519 = vmatpush.msrb.mxu0 %v2022_v35  ;;  %539 = vmatpush.msrb.mxu1 %v2024_v36 }
 0x138   :  { %559 = vmatpush.msrb.mxu2 %v2028_v37  ;;  %317 = vmatpush.msra.mxu3 %v2030_v38 }
 0x139   :  { %1446 = vrot.lane.b32.xlu2 %v2034_v39, %s1849_s0  ;;  %1102 = vrot.lane.b32.xlu1 %v2034_v39, %s1848_s1 }
 0x13a   :  { %758 = vrot.lane.b32.xlu0 %v2034_v39, %s1850_s14  ;;  %1659 = vmatmul.msk.f32.vlgmr.msrb.gmra.mxu3 %vm259_vm0, %v1997_v27 }
 0x13b   :  { %1666 = vmatmul.msk.f32.vlgmr.msra.gmra.mxu0 %vm259_vm0, %v2034_v39  ;;  %1667 = vmatmul.msk.f32.vlgmr.msra.gmra.mxu1 %vm259_vm0, %v2034_v39 }
 0x13c   :  { %1668 = vmatmul.msk.f32.vlgmr.msra.gmra.mxu2 %vm259_vm0, %v2034_v39  ;;  %520 = vmatpush.msrb.mxu0 %v2043_v40 }
 0x13d   :  { %540 = vmatpush.msrb.mxu1 %v2048_v41  ;;  %560 = vmatpush.msrb.mxu2 %v2050_v42 }
 0x13e   :  { %318 = vmatpush.msra.mxu3 %v2056_v43  ;;  %521 = vmatpush.msrb.mxu0 %v2058_v44 }
 0x13f   :  { %541 = vmatpush.msrb.mxu1 %v2063_v45  ;;  %561 = vmatpush.msrb.mxu2 %v2065_v46 }
 0x140   :  { %335 = vmatpush.msrb.mxu3 %v2069_v47  ;;  %610 = vmatpush.msra.mxu0 %v1901_v52 }
 0x141   :  { %650 = vmatpush.msra.mxu2 %v2002_v28  ;;  %630 = vmatpush.msra.mxu1 %v1949_v8 }
 0x142   :  { %1660 = vmatmul.msk.f32.vlgmr.msra.gmra.mxu3 %vm259_vm0, %v1997_v27  ;;  %611 = vmatpush.msra.mxu0 %v1911_v56 }
 0x143   :  { %651 = vmatpush.msra.mxu2 %v2017_v33  ;;  %1670 = vmatmul.msk.f32.vlgmr.msrb.gmra.mxu0 %vm259_vm0, %v2034_v39 }
 0x144   :  { %1671 = vmatmul.msk.f32.vlgmr.msrb.gmra.mxu1 %vm259_vm0, %v2034_v39  ;;  %1672 = vmatmul.msk.f32.vlgmr.msrb.gmra.mxu2 %vm259_vm0, %v2034_v39 }
 0x145   :  { %336 = vmatpush.msrb.mxu3 %v2077_v48  ;;  %631 = vmatpush.msra.mxu1 %v1959_v12 }
 0x146   :  { %652 = vmatpush.msra.mxu2 %v2030_v38  ;;  %612 = vmatpush.msra.mxu0 %v1925_v0 }
 0x147   :  { %337 = vmatpush.msrb.mxu3 %v2088_v49  ;;  %632 = vmatpush.msra.mxu1 %v1969_v16 }
 0x148   :  { %653 = vmatpush.msra.mxu2 %v2056_v43  ;;  %613 = vmatpush.msra.mxu0 %v1937_v4 }
 0x149   :  { %338 = vmatpush.msrb.mxu3 %v2093_v50  ;;  %633 = vmatpush.msra.mxu1 %v1981_v20 }
 0x14a   :  { %1661 = vmatmul.msk.f32.vlgmr.msrb.gmra.mxu3 %vm259_vm0, %v1997_v27  ;;  %730 = vmatpush.msrb.mxu2 %v1909_v55 }
 0x14b   :  { %415 = vmatpush.msra.mxu3 %v2098_v51  ;;  %690 = vmatpush.msrb.mxu0 %v1903_v53 }
 0x14c   :  { %710 = vmatpush.msrb.mxu1 %v1905_v54  ;;  %731 = vmatpush.msrb.mxu2 %v1919_v59 }
 0x14d   :  { %416 = vmatpush.msra.mxu3 %v2104_v60  ;;  %691 = vmatpush.msrb.mxu0 %v1913_v57 }
 0x14e   :  { %711 = vmatpush.msrb.mxu1 %v1917_v58  ;;  %732 = vmatpush.msrb.mxu2 %v1933_v3 }
 0x14f   :  { %417 = vmatpush.msra.mxu3 %v2111_v61  ;;  %692 = vmatpush.msrb.mxu0 %v1927_v1 }
 0x150   :  { %712 = vmatpush.msrb.mxu1 %v1929_v2  ;;  %733 = vmatpush.msrb.mxu2 %v1945_v7 }
 0x151   :  { %418 = vmatpush.msra.mxu3 %v2116_v62  ;;  %693 = vmatpush.msrb.mxu0 %v1939_v5 }
 0x152   :  { %1665 = vmatmul.msk.f32.vlgmr.msra.gmra.mxu3 %vm259_vm0, %v1997_v27  ;;  %713 = vmatpush.msrb.mxu1 %v1941_v6  ;;  %v2152_v27 = vld [vmem:[#allocation8 + $0x178] sm:$0xff] }
 0x153   :  { %498 = vmatpush.msrb.mxu3 %v2121_v63  ;;  %v2155_v6 = vld [vmem:[#allocation8 + $0x138] sm:$0xff] }
 0x155   :  { %499 = vmatpush.msrb.mxu3 %v2129_v24 }
 0x157   :  { %500 = vmatpush.msrb.mxu3 %v2136_v25 }
 0x159   :  { %501 = vmatpush.msrb.mxu3 %v2141_v26 }
 0x15a   :  { %1669 = vmatmul.msk.f32.vlgmr.msrb.gmra.mxu3 %vm259_vm0, %v2034_v39 }
 0x15b   :  { %578 = vmatpush.msra.mxu3 %v2144_v31 }
 0x15d   :  { %579 = vmatpush.msra.mxu3 %v2148_v34 }
 0x15f   :  { %580 = vmatpush.msra.mxu3 %v2152_v27 }
 0x161   :  { %581 = vmatpush.msra.mxu3 %v2155_v6 }
 0x162   :  { %1673 = vmatmul.msk.f32.vlgmr.msra.gmra.mxu3 %vm259_vm0, %v2034_v39 }
 0x163   :  { %670 = vmatpush.msrb.mxu3 %v2069_v47 }
 0x165   :  { %671 = vmatpush.msrb.mxu3 %v2077_v48 }
 0x167   :  { %672 = vmatpush.msrb.mxu3 %v2088_v49 }
 0x169   :  { %673 = vmatpush.msrb.mxu3 %v2093_v50 }
 0x16b   :  { %750 = vmatpush.msra.mxu3 %v2098_v51 }
 0x16d   :  { %751 = vmatpush.msra.mxu3 %v2104_v60 }
 0x16f   :  { %752 = vmatpush.msra.mxu3 %v2111_v61 }
 0x171   :  { %753 = vmatpush.msra.mxu3 %v2116_v62 }
 0x1a4   :  { %v595_v5 = vpop.permute.xlu0 %594 }
 0x1a5   :  { %1674 = vmatmul.msk.f32.vlgmr.msra.gmra.mxu0 %vm259_vm0, %v595_v5  ;;  %1675 = vmatmul.msk.f32.vlgmr.msra.gmra.mxu1 %vm259_vm0, %v595_v5 }
 0x1a6   :  { %1676 = vmatmul.msk.f32.vlgmr.msra.gmra.mxu2 %vm259_vm0, %v595_v5  ;;  %1677 = vmatmul.msk.f32.vlgmr.msrb.gmra.mxu3 %vm259_vm0, %v595_v5 }
 0x1a7   :  { %814 = vmatpush.msra.mxu2 %v1957_v11  ;;  %834 = vmatpush.msrb.mxu3 %v2121_v63 }
 0x1a8   :  { %774 = vmatpush.msra.mxu0 %v1951_v9  ;;  %794 = vmatpush.msra.mxu1 %v1953_v10 }
 0x1a9   :  { %815 = vmatpush.msra.mxu2 %v1967_v15  ;;  %835 = vmatpush.msrb.mxu3 %v2129_v24 }
 0x1aa   :  { %775 = vmatpush.msra.mxu0 %v1961_v13  ;;  %795 = vmatpush.msra.mxu1 %v1965_v14 }
 0x1ab   :  { %816 = vmatpush.msra.mxu2 %v1977_v19  ;;  %836 = vmatpush.msrb.mxu3 %v2136_v25 }
 0x1ac   :  { %776 = vmatpush.msra.mxu0 %v1973_v17  ;;  %796 = vmatpush.msra.mxu1 %v1975_v18 }
 0x1ad   :  { %1678 = vmatmul.msk.f32.vlgmr.msrb.gmra.mxu0 %vm259_vm0, %v595_v5  ;;  %1679 = vmatmul.msk.f32.vlgmr.msrb.gmra.mxu1 %vm259_vm0, %v595_v5 }
 0x1ae   :  { %1680 = vmatmul.msk.f32.vlgmr.msrb.gmra.mxu2 %vm259_vm0, %v595_v5  ;;  %1681 = vmatmul.msk.f32.vlgmr.msra.gmra.mxu3 %vm259_vm0, %v595_v5  ;;  %v759_v5 = vpop.permute.xlu0 %758 }
 0x1af   :  { %817 = vmatpush.msra.mxu2 %v1989_v23  ;;  %837 = vmatpush.msrb.mxu3 %v2141_v26 }
 0x1b0   :  { %v2191_v39 = vpop.f32.mrf.mxu0  ;;  %777 = vmatpush.msra.mxu0 %v1983_v21  ;;  %797 = vmatpush.msra.mxu1 %v1987_v22  ;;  %v2199_v18 = vpop.f32.mrf.mxu1 }
 0x1b1   :  { %2438 = vst [vmem:[#allocation22_spill] sm:$0xff] %v2191_v39  ;;  %894 = vmatpush.msrb.mxu2 %v2015_v32  ;;  %914 = vmatpush.msra.mxu3 %v2144_v31 }
 0x1b2   :  { %854 = vmatpush.msrb.mxu0 %v2007_v29  ;;  %874 = vmatpush.msrb.mxu1 %v2009_v30  ;;  %2439 = vst [vmem:[#allocation23_spill] sm:$0xff] %v2199_v18 }
 0x1b3   :  { %895 = vmatpush.msrb.mxu2 %v2028_v37  ;;  %915 = vmatpush.msra.mxu3 %v2148_v34 }
 0x1b4   :  { %855 = vmatpush.msrb.mxu0 %v2022_v35  ;;  %875 = vmatpush.msrb.mxu1 %v2024_v36 }
 0x1b5   :  { %v280_v39 = vpop.f32.mrf.mxu3  ;;  %1682 = vmatmul.msk.f32.vlgmr.msra.gmra.mxu0 %vm259_vm0, %v759_v5  ;;  %1683 = vmatmul.msk.f32.vlgmr.msra.gmra.mxu1 %vm259_vm0, %v759_v5 }
 0x1b6   :  { %1684 = vmatmul.msk.f32.vlgmr.msra.gmra.mxu2 %vm259_vm0, %v759_v5  ;;  %1685 = vmatmul.msk.f32.vlgmr.msrb.gmra.mxu3 %vm259_vm0, %v759_v5 }
 0x1b7   :  { %896 = vmatpush.msrb.mxu2 %v2050_v42  ;;  %916 = vmatpush.msra.mxu3 %v2152_v27  ;;  %v2219_v36 = vpop.f32.mrf.mxu2 }
 0x1b8   :  { %v443_v18 = vpop.f32.mrf.mxu0  ;;  %856 = vmatpush.msrb.mxu0 %v2043_v40  ;;  %876 = vmatpush.msrb.mxu1 %v2048_v41  ;;  %2441 = vst [vmem:[#allocation25_spill] sm:$0xff] %v2219_v36 }
 0x1b9   :  { %v2213_v35 = vmul.f32 %v443_v18, %v280_v39  ;;  %897 = vmatpush.msrb.mxu2 %v2065_v46  ;;  %917 = vmatpush.msra.mxu3 %v2155_v6  ;;  %v463_v18 = vpop.f32.mrf.mxu1 }
 0x1ba   :  { %857 = vmatpush.msrb.mxu0 %v2058_v44  ;;  %877 = vmatpush.msrb.mxu1 %v2063_v45 }
 0x1bb   :  { %2440 = vst [vmem:[#allocation24_spill] sm:$0xff] %v2213_v35  ;;  %994 = vmatpush.msra.mxu2 %v2002_v28  ;;  %1014 = vmatpush.msrb.mxu3 %v2069_v47 }
 0x1bc   :  { %954 = vmatpush.msra.mxu0 %v1901_v52  ;;  %974 = vmatpush.msra.mxu1 %v1949_v8 }
 0x1bd   :  { %v300_v39 = vpop.f32.mrf.mxu3  ;;  %1686 = vmatmul.msk.f32.vlgmr.msrb.gmra.mxu0 %vm259_vm0, %v759_v5  ;;  %1687 = vmatmul.msk.f32.vlgmr.msrb.gmra.mxu1 %vm259_vm0, %v759_v5 }
 0x1be   :  { %v2227_v35 = vmul.f32 %v463_v18, %v300_v39  ;;  %1688 = vmatmul.msk.f32.vlgmr.msrb.gmra.mxu2 %vm259_vm0, %v759_v5  ;;  %1689 = vmatmul.msk.f32.vlgmr.msra.gmra.mxu3 %vm259_vm0, %v759_v5  ;;  %v939_v5 = vpop.permute.xlu1 %938 }
 0x1bf   :  { %995 = vmatpush.msra.mxu2 %v2017_v33  ;;  %1015 = vmatpush.msrb.mxu3 %v2077_v48  ;;  %v483_v18 = vpop.f32.mrf.mxu2 }
 0x1c0   :  { %2442 = vst [vmem:[#allocation26_spill] sm:$0xff] %v2227_v35  ;;  %955 = vmatpush.msra.mxu0 %v1911_v56  ;;  %975 = vmatpush.msra.mxu1 %v1959_v12  ;;  %v2447_v35 = vld [vmem:[#allocation16_spill] sm:$0xff] }
 0x1c1   :  { %996 = vmatpush.msra.mxu2 %v2030_v38  ;;  %1016 = vmatpush.msrb.mxu3 %v2088_v49 }
 0x1c2   :  { %956 = vmatpush.msra.mxu0 %v1925_v0  ;;  %976 = vmatpush.msra.mxu1 %v1969_v16 }
 0x1c3   :  { %997 = vmatpush.msra.mxu2 %v2056_v43  ;;  %1017 = vmatpush.msrb.mxu3 %v2093_v50 }
 0x1c4   :  { %957 = vmatpush.msra.mxu0 %v1937_v4  ;;  %977 = vmatpush.msra.mxu1 %v1981_v20 }
 0x1c5   :  { %v320_v39 = vpop.f32.mrf.mxu3  ;;  %1690 = vmatmul.msk.f32.vlgmr.msra.gmra.mxu0 %vm259_vm0, %v939_v5  ;;  %1691 = vmatmul.msk.f32.vlgmr.msra.gmra.mxu1 %vm259_vm0, %v939_v5 }
 0x1c6   :  { %v2245_v36 = vmul.f32 %v483_v18, %v320_v39  ;;  %1692 = vmatmul.msk.f32.vlgmr.msra.gmra.mxu2 %vm259_vm0, %v939_v5  ;;  %1693 = vmatmul.msk.f32.vlgmr.msrb.gmra.mxu3 %vm259_vm0, %v939_v5  ;;  %v2444_v39 = vld [vmem:[#allocation13_spill] sm:$0xff] }
 0x1c7   :  { %1074 = vmatpush.msrb.mxu2 %v1909_v55  ;;  %1094 = vmatpush.msra.mxu3 %v2098_v51 }
 0x1c8   :  { %2443 = vst [vmem:[#allocation27_spill] sm:$0xff] %v2245_v36  ;;  %1034 = vmatpush.msrb.mxu0 %v1903_v53  ;;  %1054 = vmatpush.msrb.mxu1 %v1905_v54  ;;  %v2445_v36 = vld [vmem:[#allocation14_spill] sm:$0xff] }
 0x1c9   :  { %1075 = vmatpush.msrb.mxu2 %v1919_v59  ;;  %1095 = vmatpush.msra.mxu3 %v2104_v60 }
 0x1ca   :  { %1035 = vmatpush.msrb.mxu0 %v1913_v57  ;;  %1055 = vmatpush.msrb.mxu1 %v1917_v58 }
 0x1cb   :  { %1076 = vmatpush.msrb.mxu2 %v1933_v3  ;;  %1096 = vmatpush.msra.mxu3 %v2111_v61 }
 0x1cc   :  { %1036 = vmatpush.msrb.mxu0 %v1927_v1  ;;  %1056 = vmatpush.msrb.mxu1 %v1929_v2 }
 0x1cd   :  { %1077 = vmatpush.msrb.mxu2 %v1945_v7  ;;  %1097 = vmatpush.msra.mxu3 %v2116_v62  ;;  %v340_v18 = vpop.f32.mrf.mxu3 }
 0x1ce   :  { %1037 = vmatpush.msrb.mxu0 %v2444_v39  ;;  %1057 = vmatpush.msrb.mxu1 %v2445_v36 }
 0x1cf   :  { %1694 = vmatmul.msk.f32.vlgmr.msrb.gmra.mxu0 %vm259_vm0, %v939_v5  ;;  %1695 = vmatmul.msk.f32.vlgmr.msrb.gmra.mxu1 %vm259_vm0, %v939_v5 }
 0x1d0   :  { %1696 = vmatmul.msk.f32.vlgmr.msrb.gmra.mxu2 %vm259_vm0, %v939_v5  ;;  %1697 = vmatmul.msk.f32.vlgmr.msra.gmra.mxu3 %vm259_vm0, %v939_v5 }
 0x1d1   :  { %1158 = vmatpush.msra.mxu2 %v1957_v11  ;;  %1178 = vmatpush.msrb.mxu3 %v2121_v63 }
 0x1d2   :  { %1118 = vmatpush.msra.mxu0 %v1951_v9  ;;  %1138 = vmatpush.msra.mxu1 %v1953_v10 }
 0x1d3   :  { %1159 = vmatpush.msra.mxu2 %v1967_v15  ;;  %1179 = vmatpush.msrb.mxu3 %v2129_v24  ;;  %v1103_v15 = vpop.permute.xlu1 %1102 }
 0x1d4   :  { %1119 = vmatpush.msra.mxu0 %v1961_v13  ;;  %1139 = vmatpush.msra.mxu1 %v1965_v14 }
 0x1d5   :  { %1160 = vmatpush.msra.mxu2 %v1977_v19  ;;  %1180 = vmatpush.msrb.mxu3 %v2136_v25  ;;  %v2279_v5 = vpop.f32.mrf.mxu3 }
 0x1d6   :  { %2446 = vst [vmem:[#allocation13_spill] sm:$0xff] %v2279_v5  ;;  %1120 = vmatpush.msra.mxu0 %v1973_v17  ;;  %1140 = vmatpush.msra.mxu1 %v2447_v35 }
 0x1d7   :  { %1161 = vmatpush.msra.mxu2 %v1989_v23  ;;  %1181 = vmatpush.msrb.mxu3 %v2141_v26 }
 0x1d8   :  { %1121 = vmatpush.msra.mxu0 %v1983_v21  ;;  %1141 = vmatpush.msra.mxu1 %v1987_v22  ;;  %v2448_v22 = vld [vmem:[#allocation19_spill] sm:$0xff]  ;;  %v2449_v21 = vld [vmem:[#allocation20_spill] sm:$0xff] }
 0x1d9   :  { %1698 = vmatmul.msk.f32.vlgmr.msra.gmra.mxu0 %vm259_vm0, %v1103_v15  ;;  %1699 = vmatmul.msk.f32.vlgmr.msra.gmra.mxu1 %vm259_vm0, %v1103_v15 }
 0x1da   :  { %1700 = vmatmul.msk.f32.vlgmr.msra.gmra.mxu2 %vm259_vm0, %v1103_v15  ;;  %1701 = vmatmul.msk.f32.vlgmr.msrb.gmra.mxu3 %vm259_vm0, %v1103_v15 }
 0x1db   :  { %1238 = vmatpush.msrb.mxu2 %v2015_v32  ;;  %1258 = vmatpush.msra.mxu3 %v2144_v31 }
 0x1dc   :  { %1198 = vmatpush.msrb.mxu0 %v2007_v29  ;;  %1218 = vmatpush.msrb.mxu1 %v2009_v30 }
 0x1dd   :  { %1239 = vmatpush.msrb.mxu2 %v2028_v37  ;;  %1259 = vmatpush.msra.mxu3 %v2148_v34  ;;  %v503_v5 = vpop.f32.mrf.mxu3 }
 0x1de   :  { %1199 = vmatpush.msrb.mxu0 %v2448_v22  ;;  %1219 = vmatpush.msrb.mxu1 %v2449_v21  ;;  %v2299_v26 = vmul.f32 %v503_v5, %v340_v18 }
 0x1df   :  { %1240 = vmatpush.msrb.mxu2 %v2050_v42  ;;  %1260 = vmatpush.msra.mxu3 %v2152_v27 }
 0x1e0   :  { %1200 = vmatpush.msrb.mxu0 %v2043_v40  ;;  %1220 = vmatpush.msrb.mxu1 %v2048_v41 }
 0x1e1   :  { %1241 = vmatpush.msrb.mxu2 %v2065_v46  ;;  %1261 = vmatpush.msra.mxu3 %v2155_v6 }
 0x1e2   :  { %1201 = vmatpush.msrb.mxu0 %v2058_v44  ;;  %1221 = vmatpush.msrb.mxu1 %v2063_v45 }
 0x1e3   :  { %1702 = vmatmul.msk.f32.vlgmr.msrb.gmra.mxu0 %vm259_vm0, %v1103_v15  ;;  %1703 = vmatmul.msk.f32.vlgmr.msrb.gmra.mxu1 %vm259_vm0, %v1103_v15 }
 0x1e4   :  { %1704 = vmatmul.msk.f32.vlgmr.msrb.gmra.mxu2 %vm259_vm0, %v1103_v15  ;;  %1705 = vmatmul.msk.f32.vlgmr.msra.gmra.mxu3 %vm259_vm0, %v1103_v15  ;;  %v2454_v15 = vld [vmem:[#allocation24_spill] sm:$0xff] }
 0x1e5   :  { %1338 = vmatpush.msra.mxu2 %v2002_v28  ;;  %1358 = vmatpush.msrb.mxu3 %v2069_v47 }
 0x1e6   :  { %1298 = vmatpush.msra.mxu0 %v1901_v52  ;;  %1318 = vmatpush.msra.mxu1 %v1949_v8  ;;  %v1283_v52 = vpop.permute.xlu2 %1282 }
 0x1e7   :  { %1339 = vmatpush.msra.mxu2 %v2017_v33  ;;  %1359 = vmatpush.msrb.mxu3 %v2077_v48  ;;  %v2457_v33 = vld [vmem:[#allocation23_spill] sm:$0xff]  ;;  %v2460_v48 = vld [vmem:[#allocation13_spill] sm:$0xff] }
 0x1e8   :  { %1299 = vmatpush.msra.mxu0 %v1911_v56  ;;  %1319 = vmatpush.msra.mxu1 %v1959_v12  ;;  %v2452_v56 = vld [vmem:[#allocation17_spill] sm:$0xff] }
 0x1e9   :  { %1340 = vmatpush.msra.mxu2 %v2030_v38  ;;  %1360 = vmatpush.msrb.mxu3 %v2088_v49  ;;  %v2458_v38 = vld [vmem:[#allocation27_spill] sm:$0xff] }
 0x1ea   :  { %1300 = vmatpush.msra.mxu0 %v1925_v0  ;;  %1320 = vmatpush.msra.mxu1 %v1969_v16  ;;  %v563_v0 = vpop.f32.mrf.mxu2 }
 0x1eb   :  { %1341 = vmatpush.msra.mxu2 %v2056_v43  ;;  %1361 = vmatpush.msrb.mxu3 %v2093_v50 }
 0x1ec   :  { %1301 = vmatpush.msra.mxu0 %v1937_v4  ;;  %1321 = vmatpush.msra.mxu1 %v1981_v20 }
 0x1ed   :  { %1706 = vmatmul.msk.f32.vlgmr.msra.gmra.mxu0 %vm259_vm0, %v1283_v52  ;;  %1707 = vmatmul.msk.f32.vlgmr.msra.gmra.mxu1 %vm259_vm0, %v1283_v52 }
 0x1ee   :  { %1708 = vmatmul.msk.f32.vlgmr.msra.gmra.mxu2 %vm259_vm0, %v1283_v52  ;;  %1709 = vmatmul.msk.f32.vlgmr.msrb.gmra.mxu3 %vm259_vm0, %v1283_v52 }
 0x1ef   :  { %1418 = vmatpush.msrb.mxu2 %v1909_v55  ;;  %1438 = vmatpush.msra.mxu3 %v2098_v51  ;;  %v1447_v55 = vpop.permute.xlu2 %1446 }
 0x1f0   :  { %1378 = vmatpush.msrb.mxu0 %v1903_v53  ;;  %1398 = vmatpush.msrb.mxu1 %v1905_v54  ;;  %v2450_v53 = vld [vmem:[#allocation15_spill] sm:$0xff]  ;;  %v2451_v54 = vld [vmem:[#allocation21_spill] sm:$0xff] }
 0x1f1   :  { %1419 = vmatpush.msrb.mxu2 %v1919_v59  ;;  %1439 = vmatpush.msra.mxu3 %v2104_v60  ;;  %v543_v59 = vpop.f32.mrf.mxu1 }
 0x1f2   :  { %1379 = vmatpush.msrb.mxu0 %v1913_v57  ;;  %1399 = vmatpush.msrb.mxu1 %v1917_v58  ;;  %v2453_v57 = vld [vmem:[#allocation18_spill] sm:$0xff]  ;;  %v523_v58 = vpop.f32.mrf.mxu0 }
 0x1f3   :  { %1420 = vmatpush.msrb.mxu2 %v1933_v3  ;;  %1440 = vmatpush.msra.mxu3 %v2111_v61 }
 0x1f4   :  { %1380 = vmatpush.msrb.mxu0 %v1927_v1  ;;  %1400 = vmatpush.msrb.mxu1 %v1929_v2  ;;  %v583_v1 = vpop.f32.mrf.mxu3 }
 0x1f5   :  { %1421 = vmatpush.msrb.mxu2 %v1945_v7  ;;  %1441 = vmatpush.msra.mxu3 %v2116_v62  ;;  %v593_v49 = vmul.f32 %v583_v1, %v2460_v48 }
 0x1f6   :  { %1381 = vmatpush.msrb.mxu0 %v2444_v39  ;;  %1401 = vmatpush.msrb.mxu1 %v2445_v36 }
 0x1f7   :  { %1710 = vmatmul.msk.f32.vlgmr.msrb.gmra.mxu0 %vm259_vm0, %v1283_v52  ;;  %1711 = vmatmul.msk.f32.vlgmr.msrb.gmra.mxu1 %vm259_vm0, %v1283_v52 }
 0x1f8   :  { %1712 = vmatmul.msk.f32.vlgmr.msrb.gmra.mxu2 %vm259_vm0, %v1283_v52  ;;  %1713 = vmatmul.msk.f32.vlgmr.msra.gmra.mxu3 %vm259_vm0, %v1283_v52 }
 0x1f9   :  { %1502 = vmatpush.msra.mxu2 %v1957_v11  ;;  %1522 = vmatpush.msrb.mxu3 %v2121_v63 }
 0x1fa   :  { %1462 = vmatpush.msra.mxu0 %v1951_v9  ;;  %1482 = vmatpush.msra.mxu1 %v1953_v10 }
 0x1fb   :  { %1503 = vmatpush.msra.mxu2 %v2450_v53  ;;  %1523 = vmatpush.msrb.mxu3 %v2129_v24 }
 0x1fc   :  { %1463 = vmatpush.msra.mxu0 %v1961_v13  ;;  %1483 = vmatpush.msra.mxu1 %v1965_v14 }
 0x1fd   :  { %1504 = vmatpush.msra.mxu2 %v1977_v19  ;;  %1524 = vmatpush.msrb.mxu3 %v2136_v25 }
 0x1fe   :  { %1464 = vmatpush.msra.mxu0 %v1973_v17  ;;  %1484 = vmatpush.msra.mxu1 %v2447_v35  ;;  %v2455_v17 = vld [vmem:[#allocation26_spill] sm:$0xff]  ;;  %v591_v35 = vmul.f32 %v543_v59, %v2457_v33 }
 0x1ff   :  { %1505 = vmatpush.msra.mxu2 %v1989_v23  ;;  %1525 = vmatpush.msrb.mxu3 %v2451_v54 }
 0x200   :  { %1465 = vmatpush.msra.mxu0 %v2452_v56  ;;  %1485 = vmatpush.msra.mxu1 %v2453_v57 }
 0x201   :  { %1714 = vmatmul.msk.f32.vlgmr.msra.gmra.mxu0 %vm259_vm0, %v1447_v55  ;;  %1715 = vmatmul.msk.f32.vlgmr.msra.gmra.mxu1 %vm259_vm0, %v1447_v55 }
 0x202   :  { %1716 = vmatmul.msk.f32.vlgmr.msra.gmra.mxu2 %vm259_vm0, %v1447_v55  ;;  %1717 = vmatmul.msk.f32.vlgmr.msrb.gmra.mxu3 %vm259_vm0, %v1447_v55 }
 0x203   :  { %1582 = vmatpush.msrb.mxu2 %v2015_v32  ;;  %1602 = vmatpush.msra.mxu3 %v2144_v31 }
 0x204   :  { %1542 = vmatpush.msrb.mxu0 %v2007_v29  ;;  %1562 = vmatpush.msrb.mxu1 %v2009_v30  ;;  %v2456_v30 = vld [vmem:[#allocation22_spill] sm:$0xff] }
 0x205   :  { %1583 = vmatpush.msrb.mxu2 %v2028_v37  ;;  %1603 = vmatpush.msra.mxu3 %v2148_v34  ;;  %v590_v32 = vmul.f32 %v523_v58, %v2456_v30 }
 0x206   :  { %1543 = vmatpush.msrb.mxu0 %v2448_v22  ;;  %1563 = vmatpush.msrb.mxu1 %v2449_v21 }
 0x207   :  { %1584 = vmatpush.msrb.mxu2 %v2050_v42  ;;  %1604 = vmatpush.msra.mxu3 %v2152_v27 }
 0x208   :  { %1544 = vmatpush.msrb.mxu0 %v2043_v40  ;;  %1564 = vmatpush.msrb.mxu1 %v2048_v41 }
 0x209   :  { %1585 = vmatpush.msrb.mxu2 %v2065_v46  ;;  %1605 = vmatpush.msra.mxu3 %v2155_v6  ;;  %v2459_v46 = vld [vmem:[#allocation25_spill] sm:$0xff] }
 0x20a   :  { %1545 = vmatpush.msrb.mxu0 %v2058_v44  ;;  %1565 = vmatpush.msrb.mxu1 %v2063_v45  ;;  %v592_v47 = vmul.f32 %v563_v0, %v2459_v46 }
 0x20b   :  { %1718 = vmatmul.msk.f32.vlgmr.msrb.gmra.mxu0 %vm259_vm0, %v1447_v55  ;;  %1719 = vmatmul.msk.f32.vlgmr.msrb.gmra.mxu1 %vm259_vm0, %v1447_v55 }
 0x20c   :  { %1720 = vmatmul.msk.f32.vlgmr.msrb.gmra.mxu2 %vm259_vm0, %v1447_v55  ;;  %1721 = vmatmul.msk.f32.vlgmr.msra.gmra.mxu3 %vm259_vm0, %v1447_v55 }
 0x222   :  { %v615_v2 = vpop.f32.mrf.mxu0  ;;  %v635_v3 = vpop.f32.mrf.mxu1 }
 0x229   :  { %v655_v4 = vpop.f32.mrf.mxu2  ;;  %v675_v6 = vpop.f32.mrf.mxu3 }
 0x22a   :  { %v695_v7 = vpop.f32.mrf.mxu0  ;;  %v715_v8 = vpop.f32.mrf.mxu1 }
 0x231   :  { %v735_v9 = vpop.f32.mrf.mxu2  ;;  %v755_v10 = vpop.f32.mrf.mxu3 }
 0x232   :  { %v779_v11 = vpop.f32.mrf.mxu0  ;;  %v799_v12 = vpop.f32.mrf.mxu1 }
 0x233   :  { %v922_v13 = vmul.f32 %v779_v11, %v615_v2  ;;  %v923_v14 = vmul.f32 %v799_v12, %v635_v3 }
 0x235   :  { %v930_v16 = vadd.f32 %v922_v13, %v2454_v15  ;;  %v931_v19 = vadd.f32 %v923_v14, %v2455_v17 }
 0x239   :  { %v819_v20 = vpop.f32.mrf.mxu2  ;;  %v839_v21 = vpop.f32.mrf.mxu3 }
 0x23a   :  { %v924_v22 = vmul.f32 %v819_v20, %v655_v4  ;;  %v925_v23 = vmul.f32 %v839_v21, %v675_v6  ;;  %v859_v28 = vpop.f32.mrf.mxu0  ;;  %v879_v29 = vpop.f32.mrf.mxu1 }
 0x23b   :  { %v926_v36 = vmul.f32 %v859_v28, %v695_v7  ;;  %v927_v37 = vmul.f32 %v879_v29, %v715_v8 }
 0x23c   :  { %v932_v40 = vadd.f32 %v924_v22, %v2458_v38  ;;  %v933_v41 = vadd.f32 %v925_v23, %v2299_v26 }
 0x23d   :  { %v934_v42 = vadd.f32 %v926_v36, %v590_v32  ;;  %v935_v43 = vadd.f32 %v927_v37, %v591_v35 }
 0x241   :  { %v899_v44 = vpop.f32.mrf.mxu2  ;;  %v919_v45 = vpop.f32.mrf.mxu3 }
 0x242   :  { %v928_v50 = vmul.f32 %v899_v44, %v735_v9  ;;  %v929_v51 = vmul.f32 %v919_v45, %v755_v10  ;;  %v959_v60 = vpop.f32.mrf.mxu0  ;;  %v979_v61 = vpop.f32.mrf.mxu1 }
 0x244   :  { %v2401_v62 = vadd.f32 %v928_v50, %v592_v47  ;;  %v2403_v63 = vadd.f32 %v929_v51, %v593_v49 }
 0x249   :  { %v999_v24 = vpop.f32.mrf.mxu2  ;;  %v1019_v25 = vpop.f32.mrf.mxu3 }
 0x24c   :  { %v1039_v31 = vpop.f32.mrf.mxu0  ;;  %v1059_v26 = vpop.f32.mrf.mxu1 }
 0x253   :  { %v1079_v34 = vpop.f32.mrf.mxu2  ;;  %v1099_v27 = vpop.f32.mrf.mxu3 }
 0x256   :  { %v1123_v18 = vpop.f32.mrf.mxu0  ;;  %v1143_v39 = vpop.f32.mrf.mxu1 }
 0x257   :  { %v1266_v3 = vmul.f32 %v1123_v18, %v959_v60  ;;  %v1267_v4 = vmul.f32 %v1143_v39, %v979_v61 }
 0x259   :  { %v1274_v10 = vadd.f32 %v1266_v3, %v930_v16  ;;  %v1275_v11 = vadd.f32 %v1267_v4, %v931_v19 }
 0x25d   :  { %v1163_v5 = vpop.f32.mrf.mxu2  ;;  %v1183_v52 = vpop.f32.mrf.mxu3 }
 0x25e   :  { %v1268_v17 = vmul.f32 %v1163_v5, %v999_v24  ;;  %v1269_v20 = vmul.f32 %v1183_v52, %v1019_v25 }
 0x260   :  { %v1203_v53 = vpop.f32.mrf.mxu0  ;;  %v1223_v54 = vpop.f32.mrf.mxu1  ;;  %v1276_v29 = vadd.f32 %v1268_v17, %v932_v40  ;;  %v1277_v30 = vadd.f32 %v1269_v20, %v933_v41 }
 0x261   :  { %v1270_v21 = vmul.f32 %v1203_v53, %v1039_v31  ;;  %v1271_v22 = vmul.f32 %v1223_v54, %v1059_v26 }
 0x263   :  { %v1278_v37 = vadd.f32 %v1270_v21, %v934_v42  ;;  %v1279_v38 = vadd.f32 %v1271_v22, %v935_v43 }
 0x267   :  { %v1243_v55 = vpop.f32.mrf.mxu2  ;;  %v1263_v56 = vpop.f32.mrf.mxu3 }
 0x268   :  { %v1272_v48 = vmul.f32 %v1243_v55, %v1079_v34  ;;  %v1273_v49 = vmul.f32 %v1263_v56, %v1099_v27 }
 0x26a   :  { %v1303_v57 = vpop.f32.mrf.mxu0  ;;  %v1323_v58 = vpop.f32.mrf.mxu1  ;;  %v1280_v50 = vadd.f32 %v1272_v48, %v2401_v62  ;;  %v1281_v51 = vadd.f32 %v1273_v49, %v2403_v63 }
 0x271   :  { %v1343_v59 = vpop.f32.mrf.mxu2  ;;  %v1363_v0 = vpop.f32.mrf.mxu3 }
 0x274   :  { %v1383_v1 = vpop.f32.mrf.mxu0  ;;  %v1403_v2 = vpop.f32.mrf.mxu1 }
 0x27b   :  { %v1423_v6 = vpop.f32.mrf.mxu2  ;;  %v1443_v7 = vpop.f32.mrf.mxu3 }
 0x27e   :  { %v1467_v8 = vpop.f32.mrf.mxu0  ;;  %v1487_v9 = vpop.f32.mrf.mxu1 }
 0x27f   :  { %v1610_v12 = vmul.f32 %v1467_v8, %v1303_v57  ;;  %v1611_v13 = vmul.f32 %v1487_v9, %v1323_v58 }
 0x281   :  { %v1618_v14 = vadd.f32 %v1610_v12, %v1274_v10  ;;  %v1619_v15 = vadd.f32 %v1611_v13, %v1275_v11 }
 0x283   :  { %1626 = vst [vmem:[#allocation9] sm:$0xff] %v1618_v14 }
 0x284   :  { %1627 = vst [vmem:[#allocation9 + $0x8] sm:$0xff] %v1619_v15 }
 0x285   :  { %v1507_v23 = vpop.f32.mrf.mxu2  ;;  %v1527_v28 = vpop.f32.mrf.mxu3 }
 0x286   :  { %v1612_v32 = vmul.f32 %v1507_v23, %v1343_v59  ;;  %v1613_v33 = vmul.f32 %v1527_v28, %v1363_v0 }
 0x288   :  { %v1620_v35 = vadd.f32 %v1612_v32, %v1276_v29  ;;  %v1621_v36 = vadd.f32 %v1613_v33, %v1277_v30  ;;  %v1547_v16 = vpop.f32.mrf.mxu0  ;;  %v1567_v19 = vpop.f32.mrf.mxu1 }
 0x289   :  { %v1614_v44 = vmul.f32 %v1547_v16, %v1383_v1  ;;  %v1615_v45 = vmul.f32 %v1567_v19, %v1403_v2 }
 0x28a   :  { %1628 = vst [vmem:[#allocation9 + $0x10] sm:$0xff] %v1620_v35 }
 0x28b   :  { %1629 = vst [vmem:[#allocation9 + $0x18] sm:$0xff] %v1621_v36  ;;  %v1622_v46 = vadd.f32 %v1614_v44, %v1278_v37  ;;  %v1623_v47 = vadd.f32 %v1615_v45, %v1279_v38 }
 0x28d   :  { %1630 = vst [vmem:[#allocation9 + $0x20] sm:$0xff] %v1622_v46 }
 0x28e   :  { %1631 = vst [vmem:[#allocation9 + $0x28] sm:$0xff] %v1623_v47 }
 0x28f   :  { %v1587_v40 = vpop.f32.mrf.mxu2  ;;  %v1607_v41 = vpop.f32.mrf.mxu3 }
 0x290   :  { %v1616_v60 = vmul.f32 %v1587_v40, %v1423_v6  ;;  %v1617_v61 = vmul.f32 %v1607_v41, %v1443_v7 }
 0x292   :  { %v1624_v42 = vadd.f32 %v1616_v60, %v1280_v50  ;;  %v1625_v43 = vadd.f32 %v1617_v61, %v1281_v51 }
 0x294   :  { %1632 = vst [vmem:[#allocation9 + $0x30] sm:$0xff] %v1624_v42 }
 0x295   :  { %1633 = vst [vmem:[#allocation9 + $0x38] sm:$0xff] %v1625_v43 }
 0x296   :  { %1644 = dma.vmem_to_hbm [thread:$0]  %s1640_s16, 1024, %s1642_s19, [#allocation5]  }
 0x297   :  { %1838 = dma.done.wait [#allocation5], 1024  }
 0x298   :  { %1839 = vsyncadd [#allocation5], 4294966272 }
 0x299   :  { %1649 = vsyncpa [#allocation4], 1 }
 0x29a   :  { %1650 = vsyncpa [#allocation7], 1 }
 0x29b   :  { %1651 = vsyncpa [#allocation5], 1 }

</bundles_post_ra>
